<compile_context>
chip_gen: v7x
topology: tpu7x:2x2x1
jax: 0.10.0
libtpu: 0.0.40
codegen_flags: <defaults>
</compile_context>

<pallas_src>
import functools

import jax
import jax.numpy as jnp
from jax.experimental import pallas as pl
from jax.experimental.pallas import tpu as pltpu


def _round_up(x, m):
    return (x + m - 1) // m * m


def _uniform01(idx, seed):
    """Counter-based hash -> uniform f32 in [0, 1).

    Uses only int32 xor/shift/mask/mul and an int32->f32 convert so it is
    bit-identical inside the Pallas kernel and in the pure-JAX reference.
    """
    x = idx ^ (seed * jnp.int32(668265261))
    x = (x ^ ((x >> 16) & jnp.int32(0xFFFF))) * jnp.int32(0x45D9F3B)
    x = (x ^ ((x >> 16) & jnp.int32(0xFFFF))) * jnp.int32(0x45D9F3B)
    x = x ^ ((x >> 16) & jnp.int32(0xFFFF))
    x = x & jnp.int32(0xFFFFFF)                      # low 24 bits, non-negative
    return x.astype(jnp.float32) * jnp.float32(1.0 / 16777216.0)


def _critic_kernel(seed_ref,                 # SMEM (1,) int32 (scalar prefetch)
                   x_ref,                    # (TB, IN_P)   f32
                   w1_ref, b1_ref,           # (IN_P, H1P), (1, H1P)
                   w2_ref, b2_ref,           # (H1P, H2P),  (1, H2P)
                   w3_ref, b3_ref,           # (H2P, OUT_P),(1, OUT_P)
                   out_ref,                  # (TB, OUT_P)  f32
                   *, dropout_p, block_rows, h1p, h2p):
    x = x_ref[...]
    b1 = b1_ref[...]
    b2 = b2_ref[...]
    b3 = b3_ref[...]

    # Layer 1: Linear + ReLU
    h = jnp.dot(x, w1_ref[...], preferred_element_type=jnp.float32) + b1
    h = jnp.maximum(h, 0.0)

    keep = None
    if dropout_p > 0.0:
        # One draw covering both dropout layers: columns [0, H1P) -> layer 1,
        # columns [H1P, H1P+H2P) -> layer 2.  Element index is global (based
        # on the absolute batch row), so the mask is tiling-invariant.
        total_cols = h1p + h2p
        seed = seed_ref[0]
        row0 = pl.program_id(0) * block_rows
        rows = jax.lax.broadcasted_iota(jnp.int32, (block_rows, total_cols), 0) + row0
        cols = jax.lax.broadcasted_iota(jnp.int32, (block_rows, total_cols), 1)
        u = _uniform01(rows * jnp.int32(total_cols) + cols, seed)
        scale = jnp.float32(1.0 / (1.0 - dropout_p))
        keep = jnp.where(u >= jnp.float32(dropout_p), scale, jnp.float32(0.0))
        h = h * keep[:, :h1p]

    # Layer 2: Linear + ReLU
    h = jnp.dot(h, w2_ref[...], preferred_element_type=jnp.float32) + b2
    h = jnp.maximum(h, 0.0)
    if dropout_p > 0.0:
        h = h * keep[:, h1p:]

    # Layer 3: Linear (Q value, no activation)
    y = jnp.dot(h, w3_ref[...], preferred_element_type=jnp.float32) + b3
    out_ref[...] = y.astype(out_ref.dtype)


def critic_forward(states, actions, params, seed, dropout_p=0.1, block_rows=256):
    """states: (B, S) f32, actions: (B, A) f32 -> Q values (B, 1) f32."""
    x = jnp.concatenate([states, actions], axis=-1).astype(jnp.float32)
    B, in_dim = x.shape
    h1 = params["w1"].shape[1]
    h2 = params["w2"].shape[1]
    out_dim = params["w3"].shape[1]

    # Pad every lane (last) dim to a multiple of 128 (lane-dense MXU / vst).
    in_p = _round_up(in_dim, 128)
    h1p = _round_up(h1, 128)
    h2p = _round_up(h2, 128)
    out_p = _round_up(out_dim, 128)

    # Batch tile: big enough to amortize per-step overhead, multiple of 8.
    tb = block_rows if B >= block_rows else _round_up(max(B, 1), 8)
    b_p = _round_up(B, tb)

    x_p = jnp.pad(x, ((0, b_p - B), (0, in_p - in_dim)))
    w1 = jnp.pad(params["w1"], ((0, in_p - in_dim), (0, h1p - h1)))
    b1 = jnp.pad(params["b1"], ((0, 0), (0, h1p - h1)))
    w2 = jnp.pad(params["w2"], ((0, h1p - h1), (0, h2p - h2)))
    b2 = jnp.pad(params["b2"], ((0, 0), (0, h2p - h2)))
    w3 = jnp.pad(params["w3"], ((0, h2p - h2), (0, out_p - out_dim)))
    b3 = jnp.pad(params["b3"], ((0, 0), (0, out_p - out_dim)))

    seed_arr = jnp.asarray([seed], dtype=jnp.int32)

    kernel = functools.partial(
        _critic_kernel,
        dropout_p=float(dropout_p),
        block_rows=tb,
        h1p=h1p,
        h2p=h2p,
    )

    grid_spec = pltpu.PrefetchScalarGridSpec(
        num_scalar_prefetch=1,
        grid=(b_p // tb,),
        in_specs=[
            pl.BlockSpec((tb, in_p), lambda i, s: (i, 0)),      # x  (streamed)
            pl.BlockSpec((in_p, h1p), lambda i, s: (0, 0)),     # W1 (resident)
            pl.BlockSpec((1, h1p), lambda i, s: (0, 0)),        # b1
            pl.BlockSpec((h1p, h2p), lambda i, s: (0, 0)),      # W2
            pl.BlockSpec((1, h2p), lambda i, s: (0, 0)),        # b2
            pl.BlockSpec((h2p, out_p), lambda i, s: (0, 0)),    # W3
            pl.BlockSpec((1, out_p), lambda i, s: (0, 0)),      # b3
        ],
        out_specs=pl.BlockSpec((tb, out_p), lambda i, s: (i, 0)),
    )

    out = pl.pallas_call(
        kernel,
        out_shape=jax.ShapeDtypeStruct((b_p, out_p), jnp.float32),
        grid_spec=grid_spec,
        compiler_params=pltpu.CompilerParams(
            dimension_semantics=("parallel",),   # v7x: shard batch across 2 TCs
        ),
    )(seed_arr, x_p, w1, b1, w2, b2, w3, b3)

    return out[:B, :out_dim]


def critic_reference(states, actions, params, seed, dropout_p=0.1):
    """Pure-JAX reference with the SAME deterministic dropout masks."""
    x = jnp.concatenate([states, actions], axis=-1).astype(jnp.float32)
    h1 = params["w1"].shape[1]
    h2 = params["w2"].shape[1]
    h1p = _round_up(h1, 128)
    h2p = _round_up(h2, 128)

    h = jnp.maximum(x @ params["w1"] + params["b1"], 0.0)
    keep = None
    if dropout_p > 0.0:
        B = x.shape[0]
        total_cols = h1p + h2p
        rows = jax.lax.broadcasted_iota(jnp.int32, (B, total_cols), 0)
        cols = jax.lax.broadcasted_iota(jnp.int32, (B, total_cols), 1)
        u = _uniform01(rows * jnp.int32(total_cols) + cols,
                       jnp.asarray(seed, jnp.int32))
        scale = jnp.float32(1.0 / (1.0 - dropout_p))
        keep = jnp.where(u >= jnp.float32(dropout_p), scale, jnp.float32(0.0))
        h = h * keep[:, :h1]
    h = jnp.maximum(h @ params["w2"] + params["b2"], 0.0)
    if dropout_p > 0.0:
        h = h * keep[:, h1p:h1p + h2]
    return h @ params["w3"] + params["b3"]


def init_critic_params(key, state_size, action_size, hidden_neurons):
    """Mirrors the PyTorch Critic init:
       - layer1/layer2 weights ~ U(-1/sqrt(fan_in), 1/sqrt(fan_in))  (DDPG)
       - layer3 weight ~ U(-3e-3, 3e-3)
       - biases keep default nn.Linear init U(-1/sqrt(fan_in), 1/sqrt(fan_in))
       Weights stored as (in_features, out_features)."""
    h1, h2 = hidden_neurons
    in_dim = state_size + action_size
    k = jax.random.split(key, 6)

    def u(key, shape, lim):
        return jax.random.uniform(key, shape, jnp.float32, -lim, lim)

    lim1 = 1.0 / (in_dim ** 0.5)
    lim2 = 1.0 / (h1 ** 0.5)
    lim3 = 1.0 / (h2 ** 0.5)
    return {
        "w1": u(k[0], (in_dim, h1), lim1),
        "b1": u(k[1], (1, h1), lim1),
        "w2": u(k[2], (h1, h2), lim2),
        "b2": u(k[3], (1, h2), lim2),
        "w3": u(k[4], (h2, 1), 0.003),
        "b3": u(k[5], (1, 1), lim3),
    }


if __name__ == "__main__":
    # Small shapes consistent with the module docstring example.
    batch = 16
    state_size = 33
    action_size = 4
    hidden_neurons = [128, 64]
    dropout_p = 0.1
    seed = 7

    key = jax.random.PRNGKey(0)
    pkey, skey, akey = jax.random.split(key, 3)
    params = init_critic_params(pkey, state_size, action_size, hidden_neurons)
    states = jax.random.normal(skey, (batch, state_size), dtype=jnp.float32)
    actions = jax.random.uniform(akey, (batch, action_size), jnp.float32, -1.0, 1.0)

    out = critic_forward(states, actions, params, seed=seed, dropout_p=dropout_p)
    out = jax.block_until_ready(out)

    assert out.shape == (batch, 1)
    assert bool(jnp.all(jnp.isfinite(out)))

    ref = critic_reference(states, actions, params, seed=seed, dropout_p=dropout_p)
    assert bool(jnp.allclose(out, ref, atol=2e-3, rtol=2e-3)), (out, ref)

    print("KERNEL_OK")
</pallas_src>

<mosaic_0001>
module attributes {stable_mosaic.version = 11 : i64} {
  func.func @_critic_kernel(%arg0: i32, %arg1: memref<1xi32, #tpu.memory_space<smem>>, %arg2: memref<16x128xf32, #tpu.memory_space<vmem>>, %arg3: memref<128x128xf32, #tpu.memory_space<vmem>>, %arg4: memref<1x128xf32, #tpu.memory_space<vmem>>, %arg5: memref<128x128xf32, #tpu.memory_space<vmem>>, %arg6: memref<1x128xf32, #tpu.memory_space<vmem>>, %arg7: memref<128x128xf32, #tpu.memory_space<vmem>>, %arg8: memref<1x128xf32, #tpu.memory_space<vmem>>, %arg9: memref<16x128xf32, #tpu.memory_space<vmem>>) attributes {dimension_semantics = [#tpu.dimension_semantics<parallel>], iteration_bounds = array<i64: 1>, scalar_prefetch = 1 : i64, scratch_operands = 0 : i64, tpu.core_type = #tpu.core_type<tc>, window_params = [{transform_indices = @transform_0, window_bounds = array<i64: 16, 128>}, {pipeline_mode = #tpu.pipeline_mode<synchronous>, transform_indices = @transform_1, window_bounds = array<i64: 128, 128>}, {pipeline_mode = #tpu.pipeline_mode<synchronous>, transform_indices = @transform_2, window_bounds = array<i64: 1, 128>}, {pipeline_mode = #tpu.pipeline_mode<synchronous>, transform_indices = @transform_3, window_bounds = array<i64: 128, 128>}, {pipeline_mode = #tpu.pipeline_mode<synchronous>, transform_indices = @transform_4, window_bounds = array<i64: 1, 128>}, {pipeline_mode = #tpu.pipeline_mode<synchronous>, transform_indices = @transform_5, window_bounds = array<i64: 128, 128>}, {pipeline_mode = #tpu.pipeline_mode<synchronous>, transform_indices = @transform_6, window_bounds = array<i64: 1, 128>}, {transform_indices = @transform_7, window_bounds = array<i64: 16, 128>}]} {
    %c0 = arith.constant 0 : index
    %c0_0 = arith.constant 0 : index
    %0 = vector.load %arg2[%c0, %c0_0] : memref<16x128xf32, #tpu.memory_space<vmem>>, vector<16x128xf32>
    %c0_1 = arith.constant 0 : index
    %c0_2 = arith.constant 0 : index
    %1 = vector.load %arg4[%c0_1, %c0_2] : memref<1x128xf32, #tpu.memory_space<vmem>>, vector<1x128xf32>
    %c0_3 = arith.constant 0 : index
    %c0_4 = arith.constant 0 : index
    %2 = vector.load %arg6[%c0_3, %c0_4] : memref<1x128xf32, #tpu.memory_space<vmem>>, vector<1x128xf32>
    %c0_5 = arith.constant 0 : index
    %c0_6 = arith.constant 0 : index
    %3 = vector.load %arg8[%c0_5, %c0_6] : memref<1x128xf32, #tpu.memory_space<vmem>>, vector<1x128xf32>
    %c0_7 = arith.constant 0 : index
    %c0_8 = arith.constant 0 : index
    %4 = vector.load %arg3[%c0_7, %c0_8] : memref<128x128xf32, #tpu.memory_space<vmem>>, vector<128x128xf32>
    %cst = arith.constant dense<0.000000e+00> : vector<16x128xf32>
    %5 = tpu.matmul %0, %4, %cst {dimension_numbers = #tpu.dot_dimension_numbers<[1], [0], [0], [1], [0, 0, 1, 1], [], []>} : vector<16x128xf32>, vector<128x128xf32>, vector<16x128xf32> -> vector<16x128xf32>
    %6 = vector.broadcast %1 : vector<1x128xf32> to vector<16x128xf32>
    %7 = arith.addf %5, %6 : vector<16x128xf32>
    %cst_9 = arith.constant 0.000000e+00 : f32
    %8 = vector.broadcast %cst_9 : f32 to vector<16x128xf32>
    %9 = arith.maximumf %7, %8 : vector<16x128xf32>
    %c0_10 = arith.constant 0 : index
    %10 = memref.load %arg1[%c0_10] : memref<1xi32, #tpu.memory_space<smem>>
    %c16_i32 = arith.constant 16 : i32
    %11 = arith.muli %arg0, %c16_i32 : i32
    %12 = tpu.iota {dimensions = array<i32: 0>} : vector<16x256xi32>
    %13 = vector.broadcast %11 : i32 to vector<16x256xi32>
    %14 = arith.addi %12, %13 : vector<16x256xi32>
    %15 = tpu.iota {dimensions = array<i32: 1>} : vector<16x256xi32>
    %c256_i32 = arith.constant 256 : i32
    %16 = vector.broadcast %c256_i32 : i32 to vector<16x256xi32>
    %17 = arith.muli %14, %16 : vector<16x256xi32>
    %18 = arith.addi %17, %15 : vector<16x256xi32>
    %c668265261_i32 = arith.constant 668265261 : i32
    %19 = arith.muli %10, %c668265261_i32 : i32
    %20 = vector.broadcast %19 : i32 to vector<16x256xi32>
    %21 = arith.xori %18, %20 : vector<16x256xi32>
    %c16_i32_11 = arith.constant 16 : i32
    %22 = vector.broadcast %c16_i32_11 : i32 to vector<16x256xi32>
    %23 = arith.shrsi %21, %22 : vector<16x256xi32>
    %c65535_i32 = arith.constant 65535 : i32
    %24 = vector.broadcast %c65535_i32 : i32 to vector<16x256xi32>
    %25 = arith.andi %23, %24 : vector<16x256xi32>
    %26 = arith.xori %21, %25 : vector<16x256xi32>
    %c73244475_i32 = arith.constant 73244475 : i32
    %27 = vector.broadcast %c73244475_i32 : i32 to vector<16x256xi32>
    %28 = arith.muli %26, %27 : vector<16x256xi32>
    %c16_i32_12 = arith.constant 16 : i32
    %29 = vector.broadcast %c16_i32_12 : i32 to vector<16x256xi32>
    %30 = arith.shrsi %28, %29 : vector<16x256xi32>
    %c65535_i32_13 = arith.constant 65535 : i32
    %31 = vector.broadcast %c65535_i32_13 : i32 to vector<16x256xi32>
    %32 = arith.andi %30, %31 : vector<16x256xi32>
    %33 = arith.xori %28, %32 : vector<16x256xi32>
    %c73244475_i32_14 = arith.constant 73244475 : i32
    %34 = vector.broadcast %c73244475_i32_14 : i32 to vector<16x256xi32>
    %35 = arith.muli %33, %34 : vector<16x256xi32>
    %c16_i32_15 = arith.constant 16 : i32
    %36 = vector.broadcast %c16_i32_15 : i32 to vector<16x256xi32>
    %37 = arith.shrsi %35, %36 : vector<16x256xi32>
    %c65535_i32_16 = arith.constant 65535 : i32
    %38 = vector.broadcast %c65535_i32_16 : i32 to vector<16x256xi32>
    %39 = arith.andi %37, %38 : vector<16x256xi32>
    %40 = arith.xori %35, %39 : vector<16x256xi32>
    %c16777215_i32 = arith.constant 16777215 : i32
    %41 = vector.broadcast %c16777215_i32 : i32 to vector<16x256xi32>
    %42 = arith.andi %40, %41 : vector<16x256xi32>
    %43 = arith.sitofp %42 : vector<16x256xi32> to vector<16x256xf32>
    %cst_17 = arith.constant 5.96046448E-8 : f32
    %44 = vector.broadcast %cst_17 : f32 to vector<16x256xf32>
    %45 = arith.mulf %43, %44 : vector<16x256xf32>
    %cst_18 = arith.constant 1.000000e-01 : f32
    %46 = vector.broadcast %cst_18 : f32 to vector<16x256xf32>
    %47 = arith.cmpf oge, %45, %46 : vector<16x256xf32>
    %cst_19 = arith.constant 1.11111116 : f32
    %cst_20 = arith.constant 0.000000e+00 : f32
    %48 = vector.broadcast %cst_19 : f32 to vector<16x256xf32>
    %49 = vector.broadcast %cst_20 : f32 to vector<16x256xf32>
    %50 = arith.select %47, %48, %49 : vector<16x256xi1>, vector<16x256xf32>
    %51 = vector.extract_strided_slice %50 {offsets = [0, 0], sizes = [16, 128], strides = [1, 1]} : vector<16x256xf32> to vector<16x128xf32>
    %52 = arith.mulf %9, %51 : vector<16x128xf32>
    %c0_21 = arith.constant 0 : index
    %c0_22 = arith.constant 0 : index
    %53 = vector.load %arg5[%c0_21, %c0_22] : memref<128x128xf32, #tpu.memory_space<vmem>>, vector<128x128xf32>
    %cst_23 = arith.constant dense<0.000000e+00> : vector<16x128xf32>
    %54 = tpu.matmul %52, %53, %cst_23 {dimension_numbers = #tpu.dot_dimension_numbers<[1], [0], [0], [1], [0, 0, 1, 1], [], []>} : vector<16x128xf32>, vector<128x128xf32>, vector<16x128xf32> -> vector<16x128xf32>
    %55 = vector.broadcast %2 : vector<1x128xf32> to vector<16x128xf32>
    %56 = arith.addf %54, %55 : vector<16x128xf32>
    %cst_24 = arith.constant 0.000000e+00 : f32
    %57 = vector.broadcast %cst_24 : f32 to vector<16x128xf32>
    %58 = arith.maximumf %56, %57 : vector<16x128xf32>
    %59 = vector.extract_strided_slice %50 {offsets = [0, 128], sizes = [16, 128], strides = [1, 1]} : vector<16x256xf32> to vector<16x128xf32>
    %60 = arith.mulf %58, %59 : vector<16x128xf32>
    %c0_25 = arith.constant 0 : index
    %c0_26 = arith.constant 0 : index
    %61 = vector.load %arg7[%c0_25, %c0_26] : memref<128x128xf32, #tpu.memory_space<vmem>>, vector<128x128xf32>
    %cst_27 = arith.constant dense<0.000000e+00> : vector<16x128xf32>
    %62 = tpu.matmul %60, %61, %cst_27 {dimension_numbers = #tpu.dot_dimension_numbers<[1], [0], [0], [1], [0, 0, 1, 1], [], []>} : vector<16x128xf32>, vector<128x128xf32>, vector<16x128xf32> -> vector<16x128xf32>
    %63 = vector.broadcast %3 : vector<1x128xf32> to vector<16x128xf32>
    %64 = arith.addf %62, %63 : vector<16x128xf32>
    %c0_28 = arith.constant 0 : index
    %c0_29 = arith.constant 0 : index
    %65 = vector.load %arg9[%c0_28, %c0_29] : memref<16x128xf32, #tpu.memory_space<vmem>>, vector<16x128xf32>
    tpu.vector_store %arg9[%c0_28, %c0_29], %64 {strides = array<i32>} : memref<16x128xf32, #tpu.memory_space<vmem>>, vector<16x128xf32>,
    return
  }
  func.func @transform_0(%arg0: i32, %arg1: memref<1xi32, #tpu.memory_space<smem>>) -> (i32, i32) {
    %c0_i32 = arith.constant 0 : i32
    %c0_i32_0 = arith.constant 0 : i32
    return %arg0, %c0_i32 : i32, i32
  }
  func.func @transform_1(%arg0: i32, %arg1: memref<1xi32, #tpu.memory_space<smem>>) -> (i32, i32) {
    %c0_i32 = arith.constant 0 : i32
    %c0_i32_0 = arith.constant 0 : i32
    %c0_i32_1 = arith.constant 0 : i32
    return %c0_i32, %c0_i32_0 : i32, i32
  }
  func.func @transform_2(%arg0: i32, %arg1: memref<1xi32, #tpu.memory_space<smem>>) -> (i32, i32) {
    %c0_i32 = arith.constant 0 : i32
    %c0_i32_0 = arith.constant 0 : i32
    %c0_i32_1 = arith.constant 0 : i32
    return %c0_i32, %c0_i32_0 : i32, i32
  }
  func.func @transform_3(%arg0: i32, %arg1: memref<1xi32, #tpu.memory_space<smem>>) -> (i32, i32) {
    %c0_i32 = arith.constant 0 : i32
    %c0_i32_0 = arith.constant 0 : i32
    %c0_i32_1 = arith.constant 0 : i32
    return %c0_i32, %c0_i32_0 : i32, i32
  }
  func.func @transform_4(%arg0: i32, %arg1: memref<1xi32, #tpu.memory_space<smem>>) -> (i32, i32) {
    %c0_i32 = arith.constant 0 : i32
    %c0_i32_0 = arith.constant 0 : i32
    %c0_i32_1 = arith.constant 0 : i32
    return %c0_i32, %c0_i32_0 : i32, i32
  }
  func.func @transform_5(%arg0: i32, %arg1: memref<1xi32, #tpu.memory_space<smem>>) -> (i32, i32) {
    %c0_i32 = arith.constant 0 : i32
    %c0_i32_0 = arith.constant 0 : i32
    %c0_i32_1 = arith.constant 0 : i32
    return %c0_i32, %c0_i32_0 : i32, i32
  }
  func.func @transform_6(%arg0: i32, %arg1: memref<1xi32, #tpu.memory_space<smem>>) -> (i32, i32) {
    %c0_i32 = arith.constant 0 : i32
    %c0_i32_0 = arith.constant 0 : i32
    %c0_i32_1 = arith.constant 0 : i32
    return %c0_i32, %c0_i32_0 : i32, i32
  }
  func.func @transform_7(%arg0: i32, %arg1: memref<1xi32, #tpu.memory_space<smem>>) -> (i32, i32) {
    %c0_i32 = arith.constant 0 : i32
    %c0_i32_0 = arith.constant 0 : i32
    return %arg0, %c0_i32 : i32, i32
  }
}

</mosaic_0001>

<bundles_post_ra>
// kernel: tpu_custom_call.1
= control target key start
LH: loop header
LB: loop body
LE: loop exit
PB: predicated region body
PF: predicated region fallthrough
CT: control target
= control target key end

     0   :  { %14 = vsyncpa [#allocation5], 0  ;;  %s1057_s0 = inlined_call_operand.<no memory space> [shape: s32[1], index: 0, kind: input, shape index: {}]   ;;  %s1058_s1 = inlined_call_operand.hbm [shape: f32[16,128], index: 1, kind: input, shape index: {}]   ;;  %s1059_s2 = inlined_call_operand.hbm [shape: f32[128,128], index: 2, kind: input, shape index: {}]   ;;  %s1060_s3 = inlined_call_operand.vmem [shape: f32[1,128], index: 3, kind: input, shape index: {}]   ;;  %s1061_s4 = inlined_call_operand.hbm [shape: f32[128,128], index: 4, kind: input, shape index: {}]   ;;  %s1062_s5 = inlined_call_operand.vmem [shape: f32[1,128], index: 5, kind: input, shape index: {}]   ;;  %s1063_s6 = inlined_call_operand.hbm [shape: f32[128,128], index: 6, kind: input, shape index: {}]   ;;  %s1064_s7 = inlined_call_operand.vmem [shape: f32[1,128], index: 7, kind: input, shape index: {}]   ;;  %s1065_s8 = inlined_call_operand.hbm [shape: f32[16,128], index: 8, kind: output, shape index: {}]  }
   0x1   :  { %15 = vsyncpa [#allocation8], 0 }
   0x2   :  { %16 = vsyncpa [#allocation11], 0 }
   0x3   :  { %17 = vsyncpa [#allocation6], 0  ;;  %s892_s27 = smov [#allocation7]   ;;  %s893_s29 = smov [#allocation4]  }
   0x4   :  { %s35_s28 = sshll.u32 %s892_s27, 4  ;;  %s23_s30 = sshll.u32 %s893_s29, 4  ;;  %s36_s28 = int_to_ptr.vmem [resolvable:$true] %s35_s28  ;;  %s945_s30 = int_to_ptr.vmem [resolvable:$true] %s23_s30 }
   0x5   :  { %s774_s11 = scalar_lea.hbm %s1059_s2, 2048 }
   0x6   :  { %p775_p0 = scmp.ne.s32.totalorder %s1059_s2, %s774_s11  ;;  %p778_p1 = scmp.lt.u32.totalorder %s774_s11, %s1059_s2 }
   0x8   :  { %p780_p2 = pnand %p778_p1, %p775_p0 }
   0xa   :  { %783 = shalt.err (!%p780_p2)
}
   0xb   :  { %s784_s16 = scalar_lea.vmem %s36_s28, 2048  ;;  %p789_p4 = scmp.lt.s32.totalorder %s36_s28, %s36_s28 }
   0xc   :  { %p785_p3 = scmp.ne.s32.totalorder %s36_s28, %s784_s16  ;;  %p790_p5 = scmp.lt.s32.totalorder %s784_s16, %s784_s16 }
   0xe   :  { %p791_p6 = por %p790_p5, %p789_p4 }
  0x10   :  { %p792_p7 = pnand %p791_p6, %p785_p3 }
  0x12   :  { %795 = shalt.err (!%p792_p7)
}
  0x13   :  { %s894_s17 = smov 128   ;;  %s895_s18 = smov 8  }
  0x14   :  { %41 = dma.hbm_to_vmem [thread:$0]  %s1059_s2, 2048, %s36_s28, [#allocation8], %s894_s17, %s894_s17, %s895_s18  }
  0x15   :  { %s796_s23 = scalar_lea.hbm %s1058_s1, 256 }
  0x16   :  { %p797_p8 = scmp.ne.s32.totalorder %s1058_s1, %s796_s23  ;;  %p800_p9 = scmp.lt.u32.totalorder %s796_s23, %s1058_s1 }
  0x18   :  { %p802_p10 = pnand %p800_p9, %p797_p8 }
  0x1a   :  { %805 = shalt.err (!%p802_p10)
}
  0x1b   :  { %s806_s29 = scalar_lea.vmem %s945_s30, 256  ;;  %p811_p12 = scmp.lt.s32.totalorder %s945_s30, %s945_s30 }
  0x1c   :  { %p807_p11 = scmp.ne.s32.totalorder %s945_s30, %s806_s29  ;;  %p812_p13 = scmp.lt.s32.totalorder %s806_s29, %s806_s29 }
  0x1e   :  { %p813_p0 = por %p812_p13, %p811_p12 }
  0x20   :  { %p814_p1 = pnand %p813_p0, %p807_p11 }
  0x22   :  { %817 = shalt.err (!%p814_p1)
}
  0x23   :  { %29 = dma.hbm_to_vmem [thread:$0]  %s1058_s1, 256, %s945_s30, [#allocation5], %s894_s17, %s894_s17, %s895_s18  }
  0x24   :  { %s896_s9 = smov [#allocation9]   ;;  %s897_s11 = smov [#allocation10]  }
  0x25   :  { %s49_s10 = sshll.u32 %s896_s9, 4  ;;  %s63_s12 = sshll.u32 %s897_s11, 4  ;;  %s50_s10 = int_to_ptr.vmem [resolvable:$true] %s49_s10  ;;  %s982_s12 = int_to_ptr.vmem [resolvable:$true] %s63_s12 }
  0x26   :  { %s818_s15 = scalar_lea.hbm %s1061_s4, 2048 }
  0x27   :  { %p819_p2 = scmp.ne.s32.totalorder %s1061_s4, %s818_s15  ;;  %p822_p3 = scmp.lt.u32.totalorder %s818_s15, %s1061_s4 }
  0x29   :  { %p824_p4 = pnand %p822_p3, %p819_p2 }
  0x2b   :  { %827 = shalt.err (!%p824_p4)
}
  0x2c   :  { %s828_s1 = scalar_lea.vmem %s50_s10, 2048  ;;  %p833_p6 = scmp.lt.s32.totalorder %s50_s10, %s50_s10 }
  0x2d   :  { %p829_p5 = scmp.ne.s32.totalorder %s50_s10, %s828_s1  ;;  %p834_p7 = scmp.lt.s32.totalorder %s828_s1, %s828_s1 }
  0x2f   :  { %p835_p8 = por %p834_p7, %p833_p6 }
  0x31   :  { %p836_p9 = pnand %p835_p8, %p829_p5 }
  0x33   :  { %839 = shalt.err (!%p836_p9)
}
  0x34   :  { %55 = dma.hbm_to_vmem [thread:$0]  %s1061_s4, 2048, %s50_s10, [#allocation8], %s894_s17, %s894_s17, %s895_s18  }
  0x35   :  { %s840_s25 = scalar_lea.hbm %s1063_s6, 2048 }
  0x36   :  { %p841_p10 = scmp.ne.s32.totalorder %s1063_s6, %s840_s25  ;;  %p844_p11 = scmp.lt.u32.totalorder %s840_s25, %s1063_s6 }
  0x38   :  { %p846_p12 = pnand %p844_p11, %p841_p10 }
  0x3a   :  { %849 = shalt.err (!%p846_p12)
}
  0x3b   :  { %s850_s28 = scalar_lea.vmem %s982_s12, 2048  ;;  %p855_p0 = scmp.lt.s32.totalorder %s982_s12, %s982_s12 }
  0x3c   :  { %p851_p13 = scmp.ne.s32.totalorder %s982_s12, %s850_s28  ;;  %p856_p1 = scmp.lt.s32.totalorder %s850_s28, %s850_s28 }
  0x3e   :  { %p857_p2 = por %p856_p1, %p855_p0 }
  0x40   :  { %p858_p3 = pnand %p857_p2, %p851_p13 }
  0x42   :  { %861 = shalt.err (!%p858_p3)
}
  0x43   :  { %69 = dma.hbm_to_vmem [thread:$0]  %s1063_s6, 2048, %s982_s12, [#allocation11], %s894_s17, %s894_s17, %s895_s18  }
  0x44   :  { %884 = dma.done.wait [#allocation5], 256  }
  0x45   :  { %885 = vsyncadd [#allocation5], 4294967040 }
  0x46   :  { %886 = dma.done.wait [#allocation8], 4096  }
  0x47   :  { %887 = vsyncadd [#allocation8], 4294963200 }
  0x48   :  { %888 = dma.done.wait [#allocation11], 2048  }
  0x49   :  { %889 = vsyncadd [#allocation11], 4294965248  ;;  %v89_v0 = vld [vmem:[#allocation7] sm:$0xff]  ;;  %v90_v1 = vld [vmem:[#allocation7 + $0x8] sm:$0xff]  ;;  %v190_v44 = vlaneseq  ;;  %s205_s11 = smul.u32 668265261, %s1057_s0 }
  0x4a   :  { %v91_v2 = vld [vmem:[#allocation7 + $0x10] sm:$0xff]  ;;  %v670_v3 = vpack.c.bf16 %v90_v1, %v89_v0  ;;  %v92_v4 = vld [vmem:[#allocation7 + $0x18] sm:$0xff]  ;;  %v93_v6 = vld [vmem:[#allocation7 + $0x20] sm:$0xff]  ;;  %s899_s16 = smov [#allocation12]  }
  0x4b   :  { %v674_v5 = vpack.c.bf16 %v92_v4, %v91_v2  ;;  %v94_v7 = vld [vmem:[#allocation7 + $0x28] sm:$0xff]  ;;  %v95_v9 = vld [vmem:[#allocation7 + $0x30] sm:$0xff]  ;;  %v96_v10 = vld [vmem:[#allocation7 + $0x38] sm:$0xff]  ;;  %v1019_v48 = vshrl.u32 %v190_v44, 7  ;;  %v197_v53 = vand.u32 127, %v190_v44 }
  0x4c   :  { %671 = vmatprep.subr.bf16.mxu0 %v670_v3  ;;  %v678_v8 = vpack.c.bf16 %v94_v7, %v93_v6  ;;  %v84_v11 = vld [vmem:[#allocation4] sm:$0xff]  ;;  %v277_v12 = vld [vmem:[#allocation9] sm:$0xff]  ;;  %v278_v13 = vld [vmem:[#allocation9 + $0x8] sm:$0xff]  ;;  %v682_v20 = vpack.c.bf16 %v96_v10, %v95_v9 }
  0x4d   :  { %673 = vmatpush3.bf16.msra.mxu0 %v670_v3  ;;  %597 = vmatprep.mubr.f32.mxu0 %v84_v11  ;;  %v279_v14 = vld [vmem:[#allocation9 + $0x10] sm:$0xff]  ;;  %v702_v15 = vpack.c.bf16 %v278_v13, %v277_v12  ;;  %v280_v16 = vld [vmem:[#allocation9 + $0x18] sm:$0xff]  ;;  %v281_v18 = vld [vmem:[#allocation9 + $0x20] sm:$0xff]  ;;  %v192_v52 = vadd.s32 8, %v1019_v48  ;;  %v1022_v58 = vadd.s32 128, %v197_v53  ;;  %v199_v11 = vmul.u32 256, %v1019_v48 }
  0x4e   :  { %675 = vmatprep.subr.bf16.mxu0 %v674_v5  ;;  %v706_v17 = vpack.c.bf16 %v280_v16, %v279_v14  ;;  %v282_v19 = vld [vmem:[#allocation9 + $0x28] sm:$0xff]  ;;  %v97_v21 = vld [vmem:[#allocation7 + $0x40] sm:$0xff]  ;;  %v283_v24 = vld [vmem:[#allocation9 + $0x30] sm:$0xff]  ;;  %v206_v14 = vstv %s205_s11 }
  0x4f   :  { %703 = vmatprep.subr.bf16.mxu1 %v702_v15  ;;  %v98_v22 = vld [vmem:[#allocation7 + $0x48] sm:$0xff]  ;;  %v710_v23 = vpack.c.bf16 %v282_v19, %v281_v18  ;;  %v284_v25 = vld [vmem:[#allocation9 + $0x38] sm:$0xff]  ;;  %v99_v27 = vld [vmem:[#allocation7 + $0x50] sm:$0xff]  ;;  %v200_v54 = vmul.u32 256, %v192_v52  ;;  %v201_v12 = vadd.s32 %v199_v11, %v197_v53 }
  0x50   :  { %705 = vmatpush3.bf16.msra.mxu1 %v702_v15  ;;  %v686_v26 = vpack.c.bf16 %v98_v22, %v97_v21  ;;  %v100_v28 = vld [vmem:[#allocation7 + $0x58] sm:$0xff]  ;;  %v714_v29 = vpack.c.bf16 %v284_v25, %v283_v24  ;;  %v285_v30 = vld [vmem:[#allocation9 + $0x40] sm:$0xff]  ;;  %v286_v31 = vld [vmem:[#allocation9 + $0x48] sm:$0xff] }
  0x51   :  { %677 = vmatpush3.bf16.msra.mxu0 %v674_v5  ;;  %707 = vmatprep.subr.bf16.mxu1 %v706_v17  ;;  %v690_v32 = vpack.c.bf16 %v100_v28, %v99_v27  ;;  %v101_v33 = vld [vmem:[#allocation7 + $0x60] sm:$0xff]  ;;  %v102_v34 = vld [vmem:[#allocation7 + $0x68] sm:$0xff]  ;;  %v718_v35 = vpack.c.bf16 %v286_v31, %v285_v30  ;;  %v287_v36 = vld [vmem:[#allocation9 + $0x50] sm:$0xff]  ;;  %v1025_v0 = vadd.s32 %v200_v54, %v1022_v58 }
  0x52   :  { %679 = vmatprep.subr.bf16.mxu0 %v678_v8  ;;  %v288_v37 = vld [vmem:[#allocation9 + $0x58] sm:$0xff]  ;;  %v694_v38 = vpack.c.bf16 %v102_v34, %v101_v33  ;;  %v103_v39 = vld [vmem:[#allocation7 + $0x70] sm:$0xff]  ;;  %v289_v45 = vld [vmem:[#allocation9 + $0x60] sm:$0xff]  ;;  %v203_v13 = vadd.s32 %v200_v54, %v197_v53  ;;  %v207_v15 = vxor.u32 %v206_v14, %v201_v12 }
  0x53   :  { %v104_v40 = vld [vmem:[#allocation7 + $0x78] sm:$0xff]  ;;  %v722_v41 = vpack.c.bf16 %v288_v37, %v287_v36  ;;  %v290_v46 = vld [vmem:[#allocation9 + $0x68] sm:$0xff]  ;;  %v291_v49 = vld [vmem:[#allocation9 + $0x70] sm:$0xff] }
  0x54   :  { %709 = vmatpush3.bf16.msra.mxu1 %v706_v17  ;;  %v698_v42 = vpack.c.bf16 %v104_v40, %v103_v39  ;;  %v85_v43 = vld [vmem:[#allocation4 + $0x8] sm:$0xff]  ;;  %v726_v47 = vpack.c.bf16 %v290_v46, %v289_v45  ;;  %v378_v55 = vld [vmem:[#allocation10] sm:$0xff]  ;;  %v379_v56 = vld [vmem:[#allocation10 + $0x8] sm:$0xff]  ;;  %v209_v16 = vxor.u32 %v206_v14, %v203_v13  ;;  %v497_v17 = vshrl.u32 %v207_v15, 16 }
  0x55   :  { %681 = vmatpush3.bf16.msra.mxu0 %v678_v8  ;;  %711 = vmatprep.subr.bf16.mxu1 %v710_v23  ;;  %v292_v50 = vld [vmem:[#allocation9 + $0x78] sm:$0xff]  ;;  %v380_v57 = vld [vmem:[#allocation10 + $0x10] sm:$0xff]  ;;  %v734_v59 = vpack.c.bf16 %v379_v56, %v378_v55  ;;  %v382_v62 = vld [vmem:[#allocation10 + $0x20] sm:$0xff]  ;;  %v898_v45 = vmov 0.0  }
  0x56   :  { %683 = vmatprep.subr.bf16.mxu0 %v682_v20  ;;  %v730_v51 = vpack.c.bf16 %v292_v50, %v291_v49  ;;  %v381_v60 = vld [vmem:[#allocation10 + $0x18] sm:$0xff]  ;;  %v383_v63 = vld [vmem:[#allocation10 + $0x28] sm:$0xff]  ;;  %v384_v2 = vld [vmem:[#allocation10 + $0x30] sm:$0xff]  ;;  %v499_v18 = vshrl.u32 %v209_v16, 16  ;;  %v219_v19 = vxor.u32 %v497_v17, %v207_v15 }
  0x57   :  { %v738_v61 = vpack.c.bf16 %v381_v60, %v380_v57  ;;  %v742_v1 = vpack.c.bf16 %v383_v63, %v382_v62  ;;  %v385_v3 = vld [vmem:[#allocation10 + $0x38] sm:$0xff]  ;;  %v386_v5 = vld [vmem:[#allocation10 + $0x40] sm:$0xff]  ;;  %v387_v6 = vld [vmem:[#allocation10 + $0x48] sm:$0xff]  ;;  %v202_v57 = vadd.s32 %v199_v11, %v1022_v58 }
  0x58   :  { %713 = vmatpush3.bf16.msra.mxu1 %v710_v23  ;;  %v746_v4 = vpack.c.bf16 %v385_v3, %v384_v2  ;;  %v750_v7 = vpack.c.bf16 %v387_v6, %v386_v5  ;;  %v388_v8 = vld [vmem:[#allocation10 + $0x50] sm:$0xff]  ;;  %v389_v9 = vld [vmem:[#allocation10 + $0x58] sm:$0xff]  ;;  %v223_v21 = vmul.u32 73244475, %v219_v19  ;;  %v391_v52 = vld [vmem:[#allocation10 + $0x68] sm:$0xff] }
  0x59   :  { %685 = vmatpush3.bf16.msra.mxu0 %v682_v20  ;;  %715 = vmatprep.subr.bf16.mxu1 %v714_v29  ;;  %v754_v10 = vpack.c.bf16 %v389_v9, %v388_v8  ;;  %v221_v20 = vxor.u32 %v499_v18, %v209_v16  ;;  %v496_v39 = vld [vmem:[%s1060_s3] ss:$0 sm:$0xff]  ;;  %v393_v55 = vld [vmem:[#allocation10 + $0x78] sm:$0xff]  ;;  %v208_v60 = vxor.u32 %v206_v14, %v202_v57 }
  0x5a   :  { %687 = vmatprep.subr.bf16.mxu0 %v686_v26  ;;  %v501_v23 = vshrl.u32 %v223_v21, 16  ;;  %v392_v54 = vld [vmem:[#allocation10 + $0x70] sm:$0xff] }
  0x5b   :  { %v225_v22 = vmul.u32 73244475, %v221_v20  ;;  %v762_v56 = vpack.c.bf16 %v393_v55, %v392_v54  ;;  %v498_v62 = vshrl.u32 %v208_v60, 16  ;;  %v509_v18 = vld [vmem:[%s1062_s5] ss:$0 sm:$0xff]  ;;  %s482_s5 = sshll.u32 %s899_s16, 4  ;;  %s483_s5 = int_to_ptr.vmem [resolvable:$true] %s482_s5 }
  0x5c   :  { %717 = vmatpush3.bf16.msra.mxu1 %v714_v29  ;;  %v235_v25 = vxor.u32 %v501_v23, %v223_v21  ;;  %s862_s19 = scalar_lea.vmem %s483_s5, 256  ;;  %p867_p5 = scmp.lt.s32.totalorder %s483_s5, %s483_s5 }
  0x5d   :  { %689 = vmatpush3.bf16.msra.mxu0 %v686_v26  ;;  %719 = vmatprep.subr.bf16.mxu1 %v718_v35  ;;  %v503_v24 = vshrl.u32 %v225_v22, 16  ;;  %p863_p4 = scmp.ne.s32.totalorder %s483_s5, %s862_s19  ;;  %p868_p6 = scmp.lt.s32.totalorder %s862_s19, %s862_s19 }
  0x5e   :  { %691 = vmatprep.subr.bf16.mxu0 %v690_v32  ;;  %v239_v27 = vmul.u32 73244475, %v235_v25 }
  0x5f   :  { %v237_v26 = vxor.u32 %v503_v24, %v225_v22  ;;  %p869_p7 = por %p868_p6, %p867_p5 }
  0x60   :  { %721 = vmatpush3.bf16.msra.mxu1 %v718_v35  ;;  %v505_v29 = vshrl.u32 %v239_v27, 16 }
  0x61   :  { %693 = vmatpush3.bf16.msra.mxu0 %v690_v32  ;;  %723 = vmatprep.subr.bf16.mxu1 %v722_v41  ;;  %v241_v28 = vmul.u32 73244475, %v237_v26  ;;  %p870_p8 = pnand %p869_p7, %p863_p4 }
  0x62   :  { %695 = vmatprep.subr.bf16.mxu0 %v694_v38  ;;  %v251_v31 = vxor.u32 %v505_v29, %v239_v27  ;;  %v510_v29 = vld [vmem:[%s1064_s7] ss:$0 sm:$0xff] }
  0x63   :  { %v507_v30 = vshrl.u32 %v241_v28, 16 }
  0x64   :  { %725 = vmatpush3.bf16.msra.mxu1 %v722_v41  ;;  %v255_v33 = vand.u32 16777215, %v251_v31 }
  0x65   :  { %697 = vmatpush3.bf16.msra.mxu0 %v694_v38  ;;  %727 = vmatprep.subr.bf16.mxu1 %v726_v47  ;;  %v253_v32 = vxor.u32 %v507_v30, %v241_v28 }
  0x66   :  { %699 = vmatprep.subr.bf16.mxu0 %v698_v42  ;;  %v259_v35 = vcvt.s32.f32 %v255_v33 }
  0x67   :  { %v257_v34 = vand.u32 16777215, %v253_v32 }
  0x68   :  { %729 = vmatpush3.bf16.msra.mxu1 %v726_v47  ;;  %v263_v37 = vmul.f32 5.9604645e-08, %v259_v35 }
  0x69   :  { %701 = vmatpush3.bf16.msra.mxu0 %v698_v42  ;;  %731 = vmatprep.subr.bf16.mxu1 %v730_v51  ;;  %v261_v36 = vcvt.s32.f32 %v257_v34 }
  0x6a   :  { %735 = vmatprep.subr.bf16.mxu0 %v734_v59  ;;  %vm267_vm0 = vcmp.ge.f32.partialorder %v263_v37, 0.1 }
  0x6b   :  { %v265_v38 = vmul.f32 5.9604645e-08, %v261_v36  ;;  %v271_v46 = vsel %vm267_vm0, 1.1111112, %v898_v45 }
  0x6c   :  { %598 = vmatmul.mubr.f32.vlgmr.msra.gmra.mrb[0].mxu0 %v85_v43  ;;  %733 = vmatpush3.bf16.msra.mxu1 %v730_v51  ;;  %v390_v51 = vld [vmem:[#allocation10 + $0x60] sm:$0xff] }
  0x6d   :  { %737 = vmatpush3.bf16.msra.mxu0 %v734_v59  ;;  %vm269_vm1 = vcmp.ge.f32.partialorder %v265_v38, 0.1  ;;  %v758_v53 = vpack.c.bf16 %v391_v52, %v390_v51  ;;  %v210_v59 = vxor.u32 %v206_v14, %v1025_v0 }
  0x6e   :  { %739 = vmatprep.subr.bf16.mxu0 %v738_v61  ;;  %v273_v47 = vsel %vm269_vm1, 1.1111112, %v898_v45 }
  0x71   :  { %741 = vmatpush3.bf16.msra.mxu0 %v738_v61  ;;  %v500_v61 = vshrl.u32 %v210_v59, 16 }
  0x72   :  { %743 = vmatprep.subr.bf16.mxu0 %v742_v1 }
  0x73   :  { %v222_v63 = vxor.u32 %v500_v61, %v210_v59 }
  0x75   :  { %745 = vmatpush3.bf16.msra.mxu0 %v742_v1  ;;  %v220_v1 = vxor.u32 %v498_v62, %v208_v60  ;;  %v226_v2 = vmul.u32 73244475, %v222_v63 }
  0x76   :  { %747 = vmatprep.subr.bf16.mxu0 %v746_v4 }
  0x77   :  { %v224_v3 = vmul.u32 73244475, %v220_v1 }
  0x79   :  { %749 = vmatpush3.bf16.msra.mxu0 %v746_v4  ;;  %v504_v4 = vshrl.u32 %v226_v2, 16  ;;  %v502_v5 = vshrl.u32 %v224_v3, 16 }
  0x7a   :  { %751 = vmatprep.subr.bf16.mxu0 %v750_v7 }
  0x7b   :  { %v238_v6 = vxor.u32 %v504_v4, %v226_v2 }
  0x7d   :  { %753 = vmatpush3.bf16.msra.mxu0 %v750_v7  ;;  %v236_v7 = vxor.u32 %v502_v5, %v224_v3  ;;  %v242_v8 = vmul.u32 73244475, %v238_v6 }
  0x7e   :  { %755 = vmatprep.subr.bf16.mxu0 %v754_v10 }
  0x7f   :  { %v240_v9 = vmul.u32 73244475, %v236_v7 }
  0x81   :  { %757 = vmatpush3.bf16.msra.mxu0 %v754_v10  ;;  %v508_v10 = vshrl.u32 %v242_v8, 16  ;;  %v506_v12 = vshrl.u32 %v240_v9, 16 }
  0x82   :  { %759 = vmatprep.subr.bf16.mxu0 %v758_v53 }
  0x83   :  { %v254_v13 = vxor.u32 %v508_v10, %v242_v8  ;;  %v252_v15 = vxor.u32 %v506_v12, %v240_v9 }
  0x85   :  { %761 = vmatpush3.bf16.msra.mxu0 %v758_v53  ;;  %v258_v58 = vand.u32 16777215, %v254_v13  ;;  %v256_v11 = vand.u32 16777215, %v252_v15 }
  0x86   :  { %763 = vmatprep.subr.bf16.mxu0 %v762_v56 }
  0x87   :  { %v262_v0 = vcvt.s32.f32 %v258_v58  ;;  %v260_v14 = vcvt.s32.f32 %v256_v11 }
  0x89   :  { %765 = vmatpush3.bf16.msra.mxu0 %v762_v56  ;;  %v266_v16 = vmul.f32 5.9604645e-08, %v262_v0  ;;  %v264_v17 = vmul.f32 5.9604645e-08, %v260_v14 }
  0x8b   :  { %vm270_vm2 = vcmp.ge.f32.partialorder %v266_v16, 0.1  ;;  %vm268_vm3 = vcmp.ge.f32.partialorder %v264_v17, 0.1 }
  0x8c   :  { %v274_v22 = vsel %vm270_vm2, 1.1111112, %v898_v45  ;;  %v272_v25 = vsel %vm268_vm3, 1.1111112, %v898_v45 }
 0x13f   :  { %v599_v40 = vpop.f32.mrb[0].mxu0 }
 0x140   :  { %v183_v41 = vadd.f32 %v599_v40, %v496_v39  ;;  %v177_v42 = vpop.f32.mrb[1].mxu0 }
 0x141   :  { %v178_v43 = vadd.f32 %v496_v39, %v177_v42 }
 0x142   :  { %v187_v44 = vmax.f32 %v183_v41, 0.0 }
 0x143   :  { %v186_v48 = vmax.f32 %v178_v43, 0.0 }
 0x144   :  { %v276_v50 = vmul.f32 %v273_v47, %v187_v44 }
 0x145   :  { %v275_v49 = vmul.f32 %v271_v46, %v186_v48 }
 0x147   :  { %632 = vmatprep.mubr.f32.mxu1 %v275_v49 }
 0x148   :  { %633 = vmatmul.mubr.f32.vlgmr.msra.gmra.mrb[0].mxu1 %v276_v50 }
 0x21b   :  { %v634_v19 = vpop.f32.mrb[0].mxu1 }
 0x21c   :  { %v371_v20 = vadd.f32 %v634_v19, %v509_v18  ;;  %v365_v21 = vpop.f32.mrb[1].mxu1 }
 0x21d   :  { %v366_v23 = vadd.f32 %v509_v18, %v365_v21 }
 0x21e   :  { %v375_v24 = vmax.f32 %v371_v20, 0.0 }
 0x21f   :  { %v374_v26 = vmax.f32 %v366_v23, 0.0 }
 0x220   :  { %v377_v27 = vmul.f32 %v375_v24, %v274_v22 }
 0x221   :  { %v376_v28 = vmul.f32 %v374_v26, %v272_v25 }
 0x223   :  { %667 = vmatprep.mubr.f32.mxu0 %v376_v28 }
 0x224   :  { %668 = vmatmul.mubr.f32.vlgmr.msra.gmra.mrb[2].mxu0 %v377_v27 }
 0x2f7   :  { %v669_v30 = vpop.f32.mrb[2].mxu0 }
 0x2f8   :  { %v472_v31 = vadd.f32 %v669_v30, %v510_v29  ;;  %v466_v32 = vpop.f32.mrb[3].mxu0 }
 0x2f9   :  { %v467_v33 = vadd.f32 %v510_v29, %v466_v32 }
 0x2fa   :  { %476 = vst [vmem:[#allocation12 + $0x8] sm:$0xff] %v472_v31 }
 0x2fb   :  { %475 = vst [vmem:[#allocation12] sm:$0xff] %v467_v33 }
 0x2fc   :  { %873 = shalt.err (!%p870_p8)
}
 0x2fd   :  { %s874_s7 = scalar_lea.hbm %s1065_s8, 256 }
 0x2fe   :  { %p875_p9 = scmp.ne.s32.totalorder %s1065_s8, %s874_s7  ;;  %p878_p10 = scmp.lt.u32.totalorder %s874_s7, %s1065_s8 }
 0x300   :  { %p880_p11 = pnand %p878_p10, %p875_p9 }
 0x302   :  { %883 = shalt.err (!%p880_p11)
}
 0x303   :  { %488 = dma.vmem_to_hbm [thread:$0]  %s483_s5, 256, %s1065_s8, [#allocation6], %s894_s17, %s894_s17, %s895_s18  }
 0x304   :  { %890 = dma.done.wait [#allocation6], 256  }
 0x305   :  { %891 = vsyncadd [#allocation6], 4294967040 }
 0x306   :  { %492 = vsyncpa [#allocation5], 1 }
 0x307   :  { %493 = vsyncpa [#allocation8], 1 }
 0x308   :  { %494 = vsyncpa [#allocation11], 1 }
 0x309   :  { %495 = vsyncpa [#allocation6], 1 }

</bundles_post_ra>
